<compile_context>
chip_gen: v7x
topology: tpu7x:2x2x1
jax: 0.10.0
libtpu: 0.0.40
codegen_flags: <defaults>
</compile_context>

<pallas_src>
from functools import partial

import jax
import jax.numpy as jnp
from jax.experimental import pallas as pl
from jax.experimental.pallas import tpu as pltpu

_SUBLANE = 8


def _round_up(x, m):
    return ((x + m - 1) // m) * m


def _qnet_kernel(x_ref, w1_ref, b1_ref, w2_ref, b2_ref, w3_ref, b3_ref, o_ref):
    # One batch tile per grid step; weights/biases are VMEM-resident.
    # bf16 MXU inputs with f32 accumulation; bias add + ReLU stay in f32 on the
    # VPU (free filler under MXU latency).  x is cast to bf16 here (not in the
    # wrapper) so the only HBM read of x is the kernel's own DMA.
    x = x_ref[...].astype(jnp.bfloat16)                               # (tb, in)
    h1 = jnp.dot(x, w1_ref[...], preferred_element_type=jnp.float32) + b1_ref[...]
    h1 = jnp.maximum(h1, 0.0)
    h2 = jnp.dot(h1.astype(jnp.bfloat16), w2_ref[...],
                 preferred_element_type=jnp.float32) + b2_ref[...]
    h2 = jnp.maximum(h2, 0.0)
    # Final layer writes the true (tb, output_size) block: masked 3-lane stores
    # cost far less than the 42x-padded f32 writeback they replace.
    o_ref[...] = jnp.dot(h2.astype(jnp.bfloat16), w3_ref[...],
                         preferred_element_type=jnp.float32) + b3_ref[...]


def _resident(a):
    # Full-array block with a constant index_map -> stays in VMEM across the
    # whole batch grid (never re-fetched per tile).
    n = a.ndim
    return pl.BlockSpec(a.shape, lambda i: (0,) * n)


def prepare_params(params):
    """One-time (per parameter update) prep: bf16 MXU weights, f32 biases.

    Hoists the casts out of the per-step forward so the small-batch
    action-selection path doesn't re-launch cast kernels every call."""
    return {
        "w1": params["w1"].astype(jnp.bfloat16),
        "b1": params["b1"].astype(jnp.float32),
        "w2": params["w2"].astype(jnp.bfloat16),
        "b2": params["b2"].astype(jnp.float32),
        "w3": params["w3"].astype(jnp.bfloat16),
        "b3": params["b3"].astype(jnp.float32),
    }


@partial(jax.jit, static_argnames=("batch_tile",))
def linear_qnet_forward(x, params, *, batch_tile=4096):
    """x: (B, input_size) float32.  params: output of prepare_params()
    (weights stored transposed as (in_features, out_features), bf16)."""
    # Defensive no-op casts (elided by XLA when params are already prepared).
    w1 = params["w1"].astype(jnp.bfloat16)
    b1 = params["b1"].astype(jnp.float32)
    w2 = params["w2"].astype(jnp.bfloat16)
    b2 = params["b2"].astype(jnp.float32)
    w3 = params["w3"].astype(jnp.bfloat16)
    b3 = params["b3"].astype(jnp.float32)
    out_size = w3.shape[1]

    B, in_size = x.shape

    # Batch tile: as large as the batch/VMEM allows (multiple of 8 sublanes),
    # but always >= 2 grid steps when the batch isn't tiny so the "parallel"
    # batch axis can shard across both v7x TensorCores.
    b_pad8 = _round_up(B, _SUBLANE)
    tb = min(batch_tile, b_pad8)
    if tb == b_pad8 and b_pad8 >= 2 * _SUBLANE:
        tb = _round_up(b_pad8 // 2, _SUBLANE)
    tb = max(_SUBLANE, (tb // _SUBLANE) * _SUBLANE)
    b_pad = _round_up(B, tb)
    if b_pad != B:
        x = jnp.pad(x, ((0, b_pad - B), (0, 0)))

    grid = (b_pad // tb,)
    out = pl.pallas_call(
        _qnet_kernel,
        out_shape=jax.ShapeDtypeStruct((b_pad, out_size), jnp.float32),
        grid=grid,
        in_specs=[
            pl.BlockSpec((tb, in_size), lambda i: (i, 0)),   # x: batch-tiled
            _resident(w1), _resident(b1),
            _resident(w2), _resident(b2),
            _resident(w3), _resident(b3),
        ],
        out_specs=pl.BlockSpec((tb, out_size), lambda i: (i, 0)),
        compiler_params=pltpu.CompilerParams(
            dimension_semantics=("parallel",),               # megacore on v7x
            vmem_limit_bytes=48 * 1024 * 1024,               # big-tile headroom
        ),
    )(x, w1, b1, w2, b2, w3, b3)

    # Row slice only needed when the batch was padded (columns already exact).
    return out if b_pad == B else out[:B]


def init_params(key, input_size, hidden1_size, hidden2_size, output_size):
    """Mirrors nn.Linear's U(-1/sqrt(fan_in), 1/sqrt(fan_in)) init.
    Weights stored transposed: (in_features, out_features), all f32."""
    # linear3 is declared with in_features=hidden1_size in the PyTorch module
    # but consumes hidden2 activations; only consistent when they are equal.
    assert hidden1_size == hidden2_size, (
        "Linear_QNet.forward is only shape-consistent when hidden1 == hidden2")
    ks = jax.random.split(key, 6)

    def lin(kw, kb, fan_in, fan_out):
        bound = 1.0 / jnp.sqrt(fan_in)
        w = jax.random.uniform(kw, (fan_in, fan_out), jnp.float32, -bound, bound)
        b = jax.random.uniform(kb, (1, fan_out), jnp.float32, -bound, bound)
        return w, b

    w1, b1 = lin(ks[0], ks[1], input_size, hidden1_size)
    w2, b2 = lin(ks[2], ks[3], hidden1_size, hidden2_size)
    w3, b3 = lin(ks[4], ks[5], hidden1_size, output_size)
    return {"w1": w1, "b1": b1, "w2": w2, "b2": b2, "w3": w3, "b3": b3}


def reference_forward(x, p):
    """Pure-JAX reference with the same bf16-input / f32-accumulate numerics."""
    bf = lambda a: a.astype(jnp.bfloat16)
    h1 = jnp.maximum(
        jnp.dot(bf(x), bf(p["w1"]), preferred_element_type=jnp.float32) + p["b1"], 0.0)
    h2 = jnp.maximum(
        jnp.dot(bf(h1), bf(p["w2"]), preferred_element_type=jnp.float32) + p["b2"], 0.0)
    return jnp.dot(bf(h2), bf(p["w3"]), preferred_element_type=jnp.float32) + p["b3"]


if __name__ == "__main__":
    # Snake-game Q-net sizes (hidden1 == hidden2 so the original forward() is
    # shape-consistent).
    input_size, hidden1_size, hidden2_size, output_size = 11, 32, 32, 3

    key = jax.random.PRNGKey(0)
    k_params, k_a, k_b = jax.random.split(key, 3)
    params = init_params(k_params, input_size, hidden1_size, hidden2_size,
                         output_size)
    prepared = prepare_params(params)   # bf16 weight casts hoisted (done once)

    # Small multi-tile batch: exercises the 2-step batch grid (batch_tile=32),
    # VMEM-resident weights, and the narrow (B, 3) output path.
    x_a = jax.random.normal(k_a, (64, input_size), jnp.float32)
    out_a = jax.block_until_ready(
        linear_qnet_forward(x_a, prepared, batch_tile=32))
    ref_a = reference_forward(x_a, params)
    assert out_a.shape == (64, output_size)
    assert jnp.allclose(out_a, ref_a, atol=2e-3, rtol=2e-3)

    # Tiny per-step action-selection batch (row padding + single-tile path).
    x_b = jax.random.normal(k_b, (5, input_size), jnp.float32)
    out_b = jax.block_until_ready(linear_qnet_forward(x_b, prepared))
    ref_b = reference_forward(x_b, params)
    assert out_b.shape == (5, output_size)
    assert jnp.allclose(out_b, ref_b, atol=2e-3, rtol=2e-3)

    print("KERNEL_OK")
</pallas_src>

<mosaic_0001>
module attributes {stable_mosaic.version = 11 : i64} {
  func.func @_qnet_kernel(%arg0: i32, %arg1: memref<32x11xf32, #tpu.memory_space<vmem>>, %arg2: memref<11x32xbf16, #tpu.memory_space<vmem>>, %arg3: memref<1x32xf32, #tpu.memory_space<vmem>>, %arg4: memref<32x32xbf16, #tpu.memory_space<vmem>>, %arg5: memref<1x32xf32, #tpu.memory_space<vmem>>, %arg6: memref<32x3xbf16, #tpu.memory_space<vmem>>, %arg7: memref<1x3xf32, #tpu.memory_space<vmem>>, %arg8: memref<32x3xf32, #tpu.memory_space<vmem>>) attributes {dimension_semantics = [#tpu.dimension_semantics<parallel>], iteration_bounds = array<i64: 2>, scalar_prefetch = 0 : i64, scratch_operands = 0 : i64, tpu.core_type = #tpu.core_type<tc>, window_params = [{transform_indices = @transform_0, window_bounds = array<i64: 32, 11>}, {pipeline_mode = #tpu.pipeline_mode<synchronous>, transform_indices = @transform_1, window_bounds = array<i64: 11, 32>}, {pipeline_mode = #tpu.pipeline_mode<synchronous>, transform_indices = @transform_2, window_bounds = array<i64: 1, 32>}, {pipeline_mode = #tpu.pipeline_mode<synchronous>, transform_indices = @transform_3, window_bounds = array<i64: 32, 32>}, {pipeline_mode = #tpu.pipeline_mode<synchronous>, transform_indices = @transform_4, window_bounds = array<i64: 1, 32>}, {pipeline_mode = #tpu.pipeline_mode<synchronous>, transform_indices = @transform_5, window_bounds = array<i64: 32, 3>}, {pipeline_mode = #tpu.pipeline_mode<synchronous>, transform_indices = @transform_6, window_bounds = array<i64: 1, 3>}, {transform_indices = @transform_7, window_bounds = array<i64: 32, 3>}]} {
    %c0 = arith.constant 0 : index
    %c0_0 = arith.constant 0 : index
    %0 = vector.load %arg1[%c0, %c0_0] : memref<32x11xf32, #tpu.memory_space<vmem>>, vector<32x11xf32>
    %1 = arith.truncf %0 : vector<32x11xf32> to vector<32x11xbf16>
    %c0_1 = arith.constant 0 : index
    %c0_2 = arith.constant 0 : index
    %2 = vector.load %arg2[%c0_1, %c0_2] : memref<11x32xbf16, #tpu.memory_space<vmem>>, vector<11x32xbf16>
    %cst = arith.constant dense<0.000000e+00> : vector<32x32xf32>
    %3 = tpu.matmul %1, %2, %cst {dimension_numbers = #tpu.dot_dimension_numbers<[1], [0], [0], [1], [0, 0, 1, 1], [], []>} : vector<32x11xbf16>, vector<11x32xbf16>, vector<32x32xf32> -> vector<32x32xf32>
    %c0_3 = arith.constant 0 : index
    %c0_4 = arith.constant 0 : index
    %4 = vector.load %arg3[%c0_3, %c0_4] : memref<1x32xf32, #tpu.memory_space<vmem>>, vector<1x32xf32>
    %5 = vector.broadcast %4 : vector<1x32xf32> to vector<32x32xf32>
    %6 = arith.addf %3, %5 : vector<32x32xf32>
    %cst_5 = arith.constant 0.000000e+00 : f32
    %7 = vector.broadcast %cst_5 : f32 to vector<32x32xf32>
    %8 = arith.maximumf %6, %7 : vector<32x32xf32>
    %9 = arith.truncf %8 : vector<32x32xf32> to vector<32x32xbf16>
    %c0_6 = arith.constant 0 : index
    %c0_7 = arith.constant 0 : index
    %10 = vector.load %arg4[%c0_6, %c0_7] : memref<32x32xbf16, #tpu.memory_space<vmem>>, vector<32x32xbf16>
    %cst_8 = arith.constant dense<0.000000e+00> : vector<32x32xf32>
    %11 = tpu.matmul %9, %10, %cst_8 {dimension_numbers = #tpu.dot_dimension_numbers<[1], [0], [0], [1], [0, 0, 1, 1], [], []>} : vector<32x32xbf16>, vector<32x32xbf16>, vector<32x32xf32> -> vector<32x32xf32>
    %c0_9 = arith.constant 0 : index
    %c0_10 = arith.constant 0 : index
    %12 = vector.load %arg5[%c0_9, %c0_10] : memref<1x32xf32, #tpu.memory_space<vmem>>, vector<1x32xf32>
    %13 = vector.broadcast %12 : vector<1x32xf32> to vector<32x32xf32>
    %14 = arith.addf %11, %13 : vector<32x32xf32>
    %cst_11 = arith.constant 0.000000e+00 : f32
    %15 = vector.broadcast %cst_11 : f32 to vector<32x32xf32>
    %16 = arith.maximumf %14, %15 : vector<32x32xf32>
    %17 = arith.truncf %16 : vector<32x32xf32> to vector<32x32xbf16>
    %c0_12 = arith.constant 0 : index
    %c0_13 = arith.constant 0 : index
    %18 = vector.load %arg6[%c0_12, %c0_13] : memref<32x3xbf16, #tpu.memory_space<vmem>>, vector<32x3xbf16>
    %cst_14 = arith.constant dense<0.000000e+00> : vector<32x3xf32>
    %19 = tpu.matmul %17, %18, %cst_14 {dimension_numbers = #tpu.dot_dimension_numbers<[1], [0], [0], [1], [0, 0, 1, 1], [], []>} : vector<32x32xbf16>, vector<32x3xbf16>, vector<32x3xf32> -> vector<32x3xf32>
    %c0_15 = arith.constant 0 : index
    %c0_16 = arith.constant 0 : index
    %20 = vector.load %arg7[%c0_15, %c0_16] : memref<1x3xf32, #tpu.memory_space<vmem>>, vector<1x3xf32>
    %21 = vector.broadcast %20 : vector<1x3xf32> to vector<32x3xf32>
    %22 = arith.addf %19, %21 : vector<32x3xf32>
    %c0_17 = arith.constant 0 : index
    %c0_18 = arith.constant 0 : index
    %23 = vector.load %arg8[%c0_17, %c0_18] : memref<32x3xf32, #tpu.memory_space<vmem>>, vector<32x3xf32>
    tpu.vector_store %arg8[%c0_17, %c0_18], %22 {strides = array<i32>} : memref<32x3xf32, #tpu.memory_space<vmem>>, vector<32x3xf32>,
    return
  }
  func.func @transform_0(%arg0: i32) -> (i32, i32) {
    %c0_i32 = arith.constant 0 : i32
    %c0_i32_0 = arith.constant 0 : i32
    return %arg0, %c0_i32 : i32, i32
  }
  func.func @transform_1(%arg0: i32) -> (i32, i32) {
    %c0_i32 = arith.constant 0 : i32
    %c0_i32_0 = arith.constant 0 : i32
    %c0_i32_1 = arith.constant 0 : i32
    return %c0_i32, %c0_i32_0 : i32, i32
  }
  func.func @transform_2(%arg0: i32) -> (i32, i32) {
    %c0_i32 = arith.constant 0 : i32
    %c0_i32_0 = arith.constant 0 : i32
    %c0_i32_1 = arith.constant 0 : i32
    return %c0_i32, %c0_i32_0 : i32, i32
  }
  func.func @transform_3(%arg0: i32) -> (i32, i32) {
    %c0_i32 = arith.constant 0 : i32
    %c0_i32_0 = arith.constant 0 : i32
    %c0_i32_1 = arith.constant 0 : i32
    return %c0_i32, %c0_i32_0 : i32, i32
  }
  func.func @transform_4(%arg0: i32) -> (i32, i32) {
    %c0_i32 = arith.constant 0 : i32
    %c0_i32_0 = arith.constant 0 : i32
    %c0_i32_1 = arith.constant 0 : i32
    return %c0_i32, %c0_i32_0 : i32, i32
  }
  func.func @transform_5(%arg0: i32) -> (i32, i32) {
    %c0_i32 = arith.constant 0 : i32
    %c0_i32_0 = arith.constant 0 : i32
    %c0_i32_1 = arith.constant 0 : i32
    return %c0_i32, %c0_i32_0 : i32, i32
  }
  func.func @transform_6(%arg0: i32) -> (i32, i32) {
    %c0_i32 = arith.constant 0 : i32
    %c0_i32_0 = arith.constant 0 : i32
    %c0_i32_1 = arith.constant 0 : i32
    return %c0_i32, %c0_i32_0 : i32, i32
  }
  func.func @transform_7(%arg0: i32) -> (i32, i32) {
    %c0_i32 = arith.constant 0 : i32
    %c0_i32_0 = arith.constant 0 : i32
    return %arg0, %c0_i32 : i32, i32
  }
}

</mosaic_0001>

<bundles_post_ra>
// kernel: linear_qnet_forward.1
= control target key start
LH: loop header
LB: loop body
LE: loop exit
PB: predicated region body
PF: predicated region fallthrough
CT: control target
= control target key end

     0   :  { %s717_s24 = smov 0   ;;  %s769_s0 = inlined_call_operand.vmem [shape: f32[64,11], index: 0, kind: input, shape index: {}]   ;;  %s770_s1 = inlined_call_operand.vmem [shape: bf16[11,32], index: 1, kind: input, shape index: {}]   ;;  %s771_s2 = inlined_call_operand.vmem [shape: f32[1,32], index: 2, kind: input, shape index: {}]   ;;  %s772_s3 = inlined_call_operand.vmem [shape: bf16[32,32], index: 3, kind: input, shape index: {}]   ;;  %s773_s4 = inlined_call_operand.vmem [shape: f32[1,32], index: 4, kind: input, shape index: {}]   ;;  %s774_s5 = inlined_call_operand.vmem [shape: bf16[32,3], index: 5, kind: input, shape index: {}]   ;;  %s775_s6 = inlined_call_operand.vmem [shape: f32[1,3], index: 6, kind: input, shape index: {}]   ;;  %s776_s7 = inlined_call_operand.vmem [shape: f32[64,3], index: 7, kind: output, shape index: {}]  }
   0x1 LB: > { %s596_s25 = sadd.s32 4294967295, %s674_s24   ;;  %p600_p0 = scmp.ge.s32.totalorder %s674_s24, 1  ;;  %s674_s24 = sphi %s717_s24, %s17_s24  }
   0x2   : > { %p238_p1 = scmp.lt.s32.totalorder %s674_s24, 3 }
   0x4   : > { %p239_p2 = pnand %p600_p0, %p238_p1 }
   0x5   : > { %v663_v0 = vld [vmem:[%s770_s1] sm:$0x3f] (!%p239_p2)   ;;  %vm310_vm0 = vcmask (!%p239_p2), 1044480   ;;  %vm311_vm1 = vcmask (!%p239_p2), 1045504   ;;  %s601_s28 = sshll.u32 (!%p239_p2), %s596_s25, 2  ;;  %v676_v1 = vmov (!%p239_p2), 65535  }
   0x6   : > { %242 = sbr.rel (%p239_p2) target bundleno = 682 (0x2aa), region = 48  ;;  %v312_v2 = vsel (!%p239_p2), %vm310_vm0, 4294967295, %v676_v1  ;;  %p271_p3 = scmp.lt.s32.totalorder (!%p239_p2), %s601_s28, 7  ;;  %vm303_vm2 = vcmask (!%p239_p2), 89088   ;;  %v664_v11 = vld [vmem:[%s772_s3] sm:$0xff] (!%p239_p2)   ;;  %v665_v12 = vld [vmem:[%s772_s3 + $0x8] sm:$0xff] (!%p239_p2)  }
   0x7   : > { %v313_v3 = vsel (!%p239_p2), %vm311_vm1, %v312_v2, 0  ;;  %638 = vmatprep.subr.bf16.mxu1 (!%p239_p2), %v664_v11  ;;  %v605_v13 = vld [vmem:[%s771_s2] ss:$0 sm:$0xff] (!%p239_p2)  ;;  %vm395_vm3 = vcmask (!%p239_p2), 261120   ;;  %v667_v29 = vld [vmem:[%s774_s5 + $0x8] sm:$0xff] (!%p239_p2)   ;;  %vm535_vm4 = vcmask (!%p239_p2), 23552  }
   0x8   : > { %v315_v4 = vand.u32 (!%p239_p2), %v663_v0, %v313_v3  ;;  %639 = vmatpush3.bf16.msra.mxu1 (!%p239_p2), %v664_v11  ;;  %v666_v28 = vld [vmem:[%s774_s5] sm:$0xff] (!%p239_p2)  }
   0x9   : > { %640 = vmatprep.subr.bf16.mxu1 (!%p239_p2), %v665_v12  ;;  %v609_v30 = vld [vmem:[%s773_s4] ss:$0 sm:$0xff] (!%p239_p2) }
   0xa   : > { %632 = vmatprep.subr.bf16.mxu0 (!%p239_p2), %v315_v4  ;;  %v614_v45 = vld [vmem:[%s775_s6] ss:$0 sm:$0xff] (!%p239_p2) }
   0xb   : > { %633 = vmatpush3.bf16.msra.mxu0 (!%p239_p2), %v315_v4 }
   0xc   : > { %641 = vmatpush3.bf16.msra.mxu1 (!%p239_p2), %v665_v12  ;;  %646 = vmatprep.subr.bf16.mxu0 (!%p239_p2), %v666_v28 }
   0xd   : > { %s778_s28 = smov (!%p271_p3, %s601_s28), 7 }
   0xe   : > { %s602_s29 = sshll.u32 %s778_s28, 3 }
   0xf   : > { %s274_s9 = scalar_lea.vmem %s769_s0, %s602_s29  ;;  %s280_s27 = scalar_lea.vmem %s776_s7, %s602_s29 }
  0x10   : > { %v283_v5 = vld [vmem:[%s274_s9] sm:$0xff]  ;;  %v284_v6 = vld [vmem:[%s274_s9 + $0x8] sm:$0xff]  ;;  %v285_v7 = vld [vmem:[%s274_s9 + $0x10] sm:$0xff] }
  0x11   : > { %v287_v8 = vpack.c.bf16 %v284_v6, %v283_v5  ;;  %v286_v9 = vld [vmem:[%s274_s9 + $0x18] sm:$0xff] }
  0x12   : > { %v288_v10 = vpack.c.bf16 %v286_v9, %v285_v7 }
  0x13   : > { %634 = vmatprep.mubr.msk.bf16.mxu0 %vm303_vm2, %v287_v8 }
  0x14   : > { %635 = vmatmul.mubr.msk.bf16.vlgmr.msra.gmra.mrb[0].mxu0 %vm303_vm2, %v288_v10 }
  0x15   : > { %647 = vmatpush3.bf16.msra.mxu0 %v666_v28 }
  0x16   : > { %648 = vmatprep.subr.bf16.mxu0 %v667_v29 }
  0x19   : > { %649 = vmatpush3.bf16.msra.mxu0 %v667_v29 }
  0xe7   : > { %v636_v14 = vpop.f32.mrb[0].mxu0 }
  0xe8   : > { %v360_v15 = vadd.f32 %v636_v14, %v605_v13  ;;  %v351_v16 = vpop.f32.mrb[1].mxu0 }
  0xe9   : > { %v352_v17 = vadd.f32 %v605_v13, %v351_v16  ;;  %v637_v18 = vpop.f32.mrb[2].mxu0 }
  0xea   : > { %v363_v19 = vadd.f32 %v637_v18, %v605_v13  ;;  %v354_v20 = vpop.f32.mrb[3].mxu0  ;;  %v368_v22 = vmax.f32 %v360_v15, 0.0 }
  0xeb   : > { %v355_v21 = vadd.f32 %v605_v13, %v354_v20  ;;  %v366_v24 = vmax.f32 %v352_v17, 0.0 }
  0xec   : > { %v369_v23 = vmax.f32 %v363_v19, 0.0 }
  0xed   : > { %v367_v25 = vmax.f32 %v355_v21, 0.0 }
  0xee   : > { %v371_v26 = vpack.c.bf16 %v369_v23, %v368_v22 }
  0xef   : > { %v370_v27 = vpack.c.bf16 %v367_v25, %v366_v24 }
  0xf1   : > { %642 = vmatprep.mubr.msk.bf16.mxu1 %vm395_vm3, %v370_v27 }
  0xf2   : > { %643 = vmatmul.mubr.msk.bf16.vlgmr.msra.gmra.mrb[0].mxu1 %vm395_vm3, %v371_v26 }
 0x1c5   : > { %v644_v31 = vpop.f32.mrb[0].mxu1 }
 0x1c6   : > { %v445_v32 = vadd.f32 %v644_v31, %v609_v30  ;;  %v436_v33 = vpop.f32.mrb[1].mxu1 }
 0x1c7   : > { %v437_v34 = vadd.f32 %v609_v30, %v436_v33  ;;  %v645_v35 = vpop.f32.mrb[2].mxu1 }
 0x1c8   : > { %v448_v36 = vadd.f32 %v645_v35, %v609_v30  ;;  %v439_v37 = vpop.f32.mrb[3].mxu1  ;;  %v453_v39 = vmax.f32 %v445_v32, 0.0 }
 0x1c9   : > { %v440_v38 = vadd.f32 %v609_v30, %v439_v37  ;;  %v451_v41 = vmax.f32 %v437_v34, 0.0 }
 0x1ca   : > { %v454_v40 = vmax.f32 %v448_v36, 0.0 }
 0x1cb   : > { %v452_v42 = vmax.f32 %v440_v38, 0.0 }
 0x1cc   : > { %v456_v43 = vpack.c.bf16 %v454_v40, %v453_v39 }
 0x1cd   : > { %v455_v44 = vpack.c.bf16 %v452_v42, %v451_v41 }
 0x1cf   : > { %650 = vmatprep.mubr.msk.bf16.mxu0 %vm395_vm3, %v455_v44 }
 0x1d0   : > { %651 = vmatmul.mubr.msk.bf16.vlgmr.msra.gmra.mrb[4].mxu0 %vm395_vm3, %v456_v43 }
 0x2a3   : > { %v652_v46 = vpop.f32.mrb[4].mxu0 }
 0x2a4   : > { %v520_v47 = vpop.f32.mrb[5].mxu0  ;;  %v529_v52 = vadd.f32 %v652_v46, %v614_v45 }
 0x2a5   : > { %v521_v48 = vadd.f32 %v614_v45, %v520_v47  ;;  %v653_v49 = vpop.f32.mrb[6].mxu0 }
 0x2a6   : > { %v523_v50 = vpop.f32.mrb[7].mxu0  ;;  %v532_v53 = vadd.f32 %v653_v49, %v614_v45  ;;  %538 = vst.msk [vmem:[%s280_s27 + $0x10] sm:$0xff] %vm535_vm4, %v529_v52 }
 0x2a7   : > { %536 = vst.msk [vmem:[%s280_s27] sm:$0xff] %vm535_vm4, %v521_v48  ;;  %v524_v51 = vadd.f32 %v614_v45, %v523_v50 }
 0x2a8   : > { %539 = vst.msk [vmem:[%s280_s27 + $0x18] sm:$0xff] %vm535_vm4, %v532_v53 }
 0x2a9   : > { %537 = vst.msk [vmem:[%s280_s27 + $0x8] sm:$0xff] %vm535_vm4, %v524_v51 }
 0x2aa PF: > { %s17_s24 = sadd.s32 1, %s674_s24  }
 0x2ab   : > { %p14_p4 = scmp.ge.s32.totalorder %s17_s24, 4  }
 0x2ad   :  { %16 = sbr.rel (!%p14_p4) target bundleno = 1 (0x1), region = 78 }

</bundles_post_ra>
